<compile_context>
chip_gen: v6e
topology: v6e:2x2x1
jax: 0.10.0
libtpu: 0.0.40
codegen_flags: <defaults>
</compile_context>

<pallas_src>
import functools
import math

import jax
import jax.numpy as jnp
from jax.experimental import pallas as pl
from jax.experimental.pallas import tpu as pltpu


def _round_up(x, m):
    return ((x + m - 1) // m) * m


def _sdpa_kernel(x_ref, q_ref, o_ref, *, inv_scale):
    # x_ref: (TB, L, H), q_ref: (TB, 1, H), o_ref: (TB, H)
    x = x_ref[...]
    q = q_ref[...]

    # sim[b, l] = sum_h x[b,l,h] * q[b,h]   (VPU multiply + lane reduce over H)
    s = jnp.sum(x * q, axis=-1).astype(jnp.float32) * inv_scale      # (TB, L)

    # Numerically-stable softmax over L; L is the lane axis of s.
    m = jnp.max(s, axis=-1, keepdims=True)                           # (TB, 1)
    e = jnp.exp(s - m)                                               # (TB, L)
    denom = jnp.sum(e, axis=-1, keepdims=True)                       # (TB, 1)
    p = (e * pl.reciprocal(denom, approx=False)).astype(x.dtype)     # (TB, L)

    # ctx[b, h] = sum_l p[b,l] * x[b,l,h]  (VPU multiply + sublane reduce over L)
    ctx = jnp.sum(p[:, :, None] * x, axis=1)                         # (TB, H)
    o_ref[...] = ctx.astype(o_ref.dtype)


def scaled_dot_product_attention(inputs, query, *, target_block_bytes=4 << 20):
    """inputs: (B, L, H); query: (B, H) -> (B, H)."""
    B, L, H = inputs.shape
    assert query.shape == (B, H)
    inv_scale = 1.0 / math.sqrt(2.0 * H)

    itemsize = jnp.dtype(inputs.dtype).itemsize
    per_batch = max(1, L * H * itemsize)

    # Pick TB: large enough to amortize per-step overhead / reach HBM roofline,
    # small enough to double-buffer comfortably in scoped VMEM on all chips.
    tb = max(8, (target_block_bytes // per_batch) // 8 * 8)
    # Keep at least 2 grid steps when B allows it (v7x megacore sharding).
    half = _round_up(max(1, (B + 1) // 2), 8)
    tb = min(tb, half)

    b_pad = _round_up(B, tb)
    if b_pad != B:
        pad = b_pad - B
        inputs = jnp.pad(inputs, ((0, pad), (0, 0), (0, 0)))
        query = jnp.pad(query, ((0, pad), (0, 0)))
    q3 = query.reshape(b_pad, 1, H)

    kernel = functools.partial(_sdpa_kernel, inv_scale=inv_scale)
    out = pl.pallas_call(
        kernel,
        out_shape=jax.ShapeDtypeStruct((b_pad, H), inputs.dtype),
        grid_spec=pltpu.PrefetchScalarGridSpec(
            num_scalar_prefetch=0,
            grid=(b_pad // tb,),
            in_specs=[
                pl.BlockSpec((tb, L, H), lambda b: (b, 0, 0)),
                pl.BlockSpec((tb, 1, H), lambda b: (b, 0, 0)),
            ],
            out_specs=pl.BlockSpec((tb, H), lambda b: (b, 0)),
        ),
        compiler_params=pltpu.CompilerParams(
            dimension_semantics=("parallel",),
            vmem_limit_bytes=32 * 1024 * 1024,
        ),
    )(inputs, q3)
    return out[:B]


def _reference(inputs, query):
    H = inputs.shape[-1]
    scale = math.sqrt(2.0 * H)
    sim = jnp.einsum('blh,bh->bl', inputs, query) / scale
    att = jax.nn.softmax(sim, axis=1)
    return jnp.einsum('blh,bl->bh', inputs, att)


if __name__ == "__main__":
    B, L, H = 2, 8, 32
    key = jax.random.PRNGKey(0)
    k1, k2 = jax.random.split(key)
    inputs = jax.random.normal(k1, (B, L, H), dtype=jnp.float32)
    query = jax.random.normal(k2, (B, H), dtype=jnp.float32)

    out = scaled_dot_product_attention(inputs, query)
    jax.block_until_ready(out)

    ref = _reference(inputs, query)
    assert out.shape == (B, H)
    assert jnp.allclose(out, ref, atol=1e-5, rtol=1e-5), (
        f"max abs err = {jnp.max(jnp.abs(out - ref))}")

    print("KERNEL_OK")
</pallas_src>

<mosaic_0001>
module attributes {stable_mosaic.version = 11 : i64} {
  func.func @_sdpa_kernel(%arg0: i32, %arg1: memref<8x8x32xf32, #tpu.memory_space<vmem>>, %arg2: memref<8x1x32xf32, #tpu.memory_space<vmem>>, %arg3: memref<8x32xf32, #tpu.memory_space<vmem>>) attributes {dimension_semantics = [#tpu.dimension_semantics<parallel>], iteration_bounds = array<i64: 1>, scalar_prefetch = 0 : i64, scratch_operands = 0 : i64, tpu.core_type = #tpu.core_type<tc>, window_params = [{transform_indices = @transform_0, window_bounds = array<i64: 8, 8, 32>}, {transform_indices = @transform_1, window_bounds = array<i64: 8, 1, 32>}, {transform_indices = @transform_2, window_bounds = array<i64: 8, 32>}]} {
    %c0 = arith.constant 0 : index
    %c0_0 = arith.constant 0 : index
    %c0_1 = arith.constant 0 : index
    %0 = vector.load %arg1[%c0, %c0_0, %c0_1] : memref<8x8x32xf32, #tpu.memory_space<vmem>>, vector<8x8x32xf32>
    %c0_2 = arith.constant 0 : index
    %c0_3 = arith.constant 0 : index
    %c0_4 = arith.constant 0 : index
    %1 = vector.load %arg2[%c0_2, %c0_3, %c0_4] : memref<8x1x32xf32, #tpu.memory_space<vmem>>, vector<8x1x32xf32>
    %2 = vector.broadcast %1 : vector<8x1x32xf32> to vector<8x8x32xf32>
    %3 = arith.mulf %0, %2 : vector<8x8x32xf32>
    %cst = arith.constant dense<0.000000e+00> : vector<8x8xf32>
    %4 = vector.multi_reduction <add>, %3, %cst [2] : vector<8x8x32xf32> to vector<8x8xf32>
    %cst_5 = arith.constant 1.250000e-01 : f32
    %5 = vector.broadcast %cst_5 : f32 to vector<8x8xf32>
    %6 = arith.mulf %4, %5 : vector<8x8xf32>
    %cst_6 = arith.constant dense<0xFF800000> : vector<8xf32>
    %7 = vector.multi_reduction <maximumf>, %6, %cst_6 [1] : vector<8x8xf32> to vector<8xf32>
    %8 = vector.shape_cast %7 : vector<8xf32> to vector<8x1xf32>
    %9 = vector.broadcast %8 : vector<8x1xf32> to vector<8x8xf32>
    %10 = arith.subf %6, %9 : vector<8x8xf32>
    %11 = math.exp %10 : vector<8x8xf32>
    %cst_7 = arith.constant dense<0.000000e+00> : vector<8xf32>
    %12 = vector.multi_reduction <add>, %11, %cst_7 [1] : vector<8x8xf32> to vector<8xf32>
    %13 = vector.shape_cast %12 : vector<8xf32> to vector<8x1xf32>
    %14 = tpu.reciprocal %13 : vector<8x1xf32> -> vector<8x1xf32>
    %15 = vector.broadcast %14 : vector<8x1xf32> to vector<8x8xf32>
    %16 = arith.mulf %11, %15 : vector<8x8xf32>
    %17 = vector.shape_cast %16 : vector<8x8xf32> to vector<8x8x1xf32>
    %18 = vector.broadcast %17 : vector<8x8x1xf32> to vector<8x8x32xf32>
    %19 = arith.mulf %18, %0 : vector<8x8x32xf32>
    %cst_8 = arith.constant dense<0.000000e+00> : vector<8x32xf32>
    %20 = vector.multi_reduction <add>, %19, %cst_8 [1] : vector<8x8x32xf32> to vector<8x32xf32>
    %c0_9 = arith.constant 0 : index
    %c0_10 = arith.constant 0 : index
    %21 = vector.load %arg3[%c0_9, %c0_10] : memref<8x32xf32, #tpu.memory_space<vmem>>, vector<8x32xf32>
    tpu.vector_store %arg3[%c0_9, %c0_10], %20 {strides = array<i32>} : memref<8x32xf32, #tpu.memory_space<vmem>>, vector<8x32xf32>,
    return
  }
  func.func @transform_0(%arg0: i32) -> (i32, i32, i32) {
    %c0_i32 = arith.constant 0 : i32
    %c0_i32_0 = arith.constant 0 : i32
    %c0_i32_1 = arith.constant 0 : i32
    return %arg0, %c0_i32, %c0_i32_0 : i32, i32, i32
  }
  func.func @transform_1(%arg0: i32) -> (i32, i32, i32) {
    %c0_i32 = arith.constant 0 : i32
    %c0_i32_0 = arith.constant 0 : i32
    %c0_i32_1 = arith.constant 0 : i32
    return %arg0, %c0_i32, %c0_i32_0 : i32, i32, i32
  }
  func.func @transform_2(%arg0: i32) -> (i32, i32) {
    %c0_i32 = arith.constant 0 : i32
    %c0_i32_0 = arith.constant 0 : i32
    return %arg0, %c0_i32 : i32, i32
  }
}

</mosaic_0001>

<bundles_post_ra>
// kernel: tpu_custom_call.1
= control target key start
LH: loop header
LB: loop body
LE: loop exit
PB: predicated region body
PF: predicated region fallthrough
CT: control target
= control target key end

     0   :  { %7 = vsyncpa [#allocation3], 0  ;;  %s800_s0 = inlined_call_operand.hbm [shape: f32[8,8,32], index: 0, kind: input, shape index: {}]   ;;  %s801_s1 = inlined_call_operand.hbm [shape: f32[8,1,32], index: 1, kind: input, shape index: {}]   ;;  %s802_s2 = inlined_call_operand.hbm [shape: f32[8,32], index: 2, kind: output, shape index: {}]  }
   0x1   :  { %8 = vsyncpa [#allocation6], 0 }
   0x2   :  { %9 = vsyncpa [#allocation4], 0  ;;  %s635_s9 = smov [#allocation2]  }
   0x3   :  { %s15_s10 = sshll.u32 %s635_s9, 4  ;;  %s16_s10 = int_to_ptr.vmem [resolvable:$true] %s15_s10 }
   0x4   :  { %s577_s11 = scalar_lea.vmem %s16_s10, 1024  ;;  %p582_p1 = scmp.lt.s32.totalorder %s16_s10, %s16_s10 }
   0x5   :  { %p578_p0 = scmp.ne.s32.totalorder %s16_s10, %s577_s11  ;;  %p583_p2 = scmp.lt.s32.totalorder %s577_s11, %s577_s11 }
   0x7   :  { %p584_p3 = por %p583_p2, %p582_p1 }
   0x9   :  { %p585_p4 = pnand %p584_p3, %p578_p0 }
   0xb   :  { %588 = shalt.err (!%p585_p4)
}
   0xc   :  { %s636_s12 = smov 128   ;;  %s637_s13 = smov 8  }
   0xd   :  { %21 = dma.hbm_to_vmem [thread:$0]  %s800_s0, 1024, %s16_s10, [#allocation3], %s636_s12, %s636_s12, %s637_s13  }
   0xe   :  { %s638_s16 = smov [#allocation5]  }
   0xf   :  { %s27_s17 = sshll.u32 %s638_s16, 4  ;;  %s28_s17 = int_to_ptr.vmem [resolvable:$true] %s27_s17 }
  0x10   :  { %s597_s18 = scalar_lea.vmem %s28_s17, 128  ;;  %p602_p6 = scmp.lt.s32.totalorder %s28_s17, %s28_s17 }
  0x11   :  { %p598_p5 = scmp.ne.s32.totalorder %s28_s17, %s597_s18  ;;  %p603_p7 = scmp.lt.s32.totalorder %s597_s18, %s597_s18 }
  0x13   :  { %p604_p8 = por %p603_p7, %p602_p6 }
  0x15   :  { %p605_p9 = pnand %p604_p8, %p598_p5 }
  0x17   :  { %608 = shalt.err (!%p605_p9)
}
  0x18   :  { %s639_s19 = smov 16   ;;  %s640_s20 = smov 1  }
  0x19   :  { %33 = dma.hbm_to_vmem [thread:$0]  %s801_s1, 128, %s28_s17, [#allocation6], %s639_s19, %s639_s19, %s640_s20  }
  0x1a   :  { %629 = dma.done.wait [#allocation3], 1024  }
  0x1b   :  { %630 = vsyncadd [#allocation3], 4294966272 }
  0x1c   :  { %631 = dma.done.wait [#allocation6], 128  }
  0x1d   :  { %632 = vsyncadd [#allocation6], 4294967168  ;;  %v664_v0 = vld [vmem:[#allocation2] sm:$0xff]  ;;  %vm112_vm0 = vcmask 261120   ;;  %v666_v2 = vld [vmem:[#allocation2 + $0x10] sm:$0xff]  ;;  %v153_v32 = vlaneseq  ;;  %vm187_vm1 = vcmask 1041409  }
  0x1e   :  { %v533_v1 = vld [vmem:[#allocation5] ss:$0 sm:$0xff]  ;;  %v535_v4 = vld [vmem:[#allocation5 + $0x2] ss:$0 sm:$0xff]  ;;  %v669_v5 = vld [vmem:[#allocation2 + $0x8] sm:$0xff]  ;;  %vm189_vm2 = vcmask 1042434  }
  0x1f   :  { %v104_v3 = vmul.f32 %v533_v1, %v664_v0  ;;  %v534_v6 = vld [vmem:[#allocation5 + $0x1] ss:$0 sm:$0xff]  ;;  %v106_v7 = vmul.f32 %v535_v4, %v666_v2  ;;  %v673_v9 = vld [vmem:[#allocation2 + $0x18] sm:$0xff]  ;;  %v536_v10 = vld [vmem:[#allocation5 + $0x3] ss:$0 sm:$0xff]  ;;  %v154_v33 = vand.u32 127, %v153_v32 }
  0x20   :  { %v105_v8 = vmul.f32 %v534_v6, %v669_v5  ;;  %v675_v11 = vld [vmem:[#allocation2 + $0x20] sm:$0xff]  ;;  %v107_v13 = vmul.f32 %v536_v10, %v673_v9  ;;  %v679_v15 = vld [vmem:[#allocation2 + $0x28] sm:$0xff]  ;;  %v686_v22 = vld [vmem:[#allocation2 + $0x30] sm:$0xff]  ;;  %v696_v34 = vshrl.u32 %v153_v32, 7  ;;  %vm191_vm3 = vcmask 1043459   ;;  %s642_s0 = smov [#allocation7]  }
  0x21   :  { %v113_v12 = vsel %vm112_vm0, %v104_v3, 0.0  ;;  %v537_v14 = vld [vmem:[#allocation5 + $0x4] ss:$0 sm:$0xff]  ;;  %v538_v16 = vld [vmem:[#allocation5 + $0x5] ss:$0 sm:$0xff]  ;;  %v119_v17 = vsel %vm112_vm0, %v106_v7, 0.0 }
  0x22   :  { %114 = vadd.xlane.f32.xlu0 %v113_v12  ;;  %120 = vadd.xlane.f32.xlu1 %v119_v17  ;;  %v116_v18 = vsel %vm112_vm0, %v105_v8, 0.0  ;;  %v108_v19 = vmul.f32 %v537_v14, %v675_v11  ;;  %v122_v20 = vsel %vm112_vm0, %v107_v13, 0.0  ;;  %v109_v21 = vmul.f32 %v538_v16, %v679_v15  ;;  %v539_v23 = vld [vmem:[#allocation5 + $0x6] ss:$0 sm:$0xff]  ;;  %v688_v24 = vld [vmem:[#allocation2 + $0x38] sm:$0xff]  ;;  %s523_s1 = sshll.u32 %s642_s0, 4  ;;  %s524_s1 = int_to_ptr.vmem [resolvable:$true] %s523_s1 }
  0x23   :  { %v540_v25 = vld [vmem:[#allocation5 + $0x7] ss:$0 sm:$0xff]  ;;  %v110_v27 = vmul.f32 %v539_v23, %v686_v22  ;;  %v699_v37 = vsub.s32 %v154_v33, %v696_v34  ;;  %vm193_vm4 = vcmask 1044484   ;;  %vm195_vm5 = vcmask 1045509   ;;  %s609_s23 = scalar_lea.vmem %s524_s1, 128  ;;  %p614_p11 = scmp.lt.s32.totalorder %s524_s1, %s524_s1 }
  0x24   :  { %v125_v26 = vsel %vm112_vm0, %v108_v19, 0.0  ;;  %v128_v28 = vsel %vm112_vm0, %v109_v21, 0.0  ;;  %v111_v29 = vmul.f32 %v540_v25, %v688_v24  ;;  %vm197_vm6 = vcmask 1046534   ;;  %p610_p10 = scmp.ne.s32.totalorder %s524_s1, %s609_s23  ;;  %p615_p12 = scmp.lt.s32.totalorder %s609_s23, %s609_s23 }
  0x25   :  { %v131_v30 = vsel %vm112_vm0, %v110_v27, 0.0  ;;  %vm199_vm7 = vcmask 1047559   ;;  %vm202_vm8 = vcmask 64512   ;;  %v641_v7 = vmov 0  }
  0x26   :  { %117 = vadd.xlane.f32.xlu0 %v116_v18  ;;  %123 = vadd.xlane.f32.xlu1 %v122_v20  ;;  %v134_v31 = vsel %vm112_vm0, %v111_v29, 0.0  ;;  %v209_v8 = vsub.s32 0, %v696_v34  ;;  %v213_v10 = vsub.s32 1, %v696_v34  ;;  %v217_v12 = vsub.s32 2, %v696_v34  ;;  %p616_p13 = por %p615_p12, %p614_p11 }
  0x27   :  { %550 = vset.pattern.permute.xlu0 %v641_v7  ;;  %549 = vset.pattern.permute.xlu1 %v641_v7  ;;  %v221_v13 = vsub.s32 3, %v696_v34  ;;  %v225_v19 = vsub.s32 4, %v696_v34  ;;  %v233_v32 = vsub.s32 6, %v696_v34 }
  0x28   :  { %p617_p0 = pnand %p616_p13, %p610_p10 }
  0x2a   :  { %126 = vadd.xlane.f32.xlu0 %v125_v26  ;;  %129 = vadd.xlane.f32.xlu1 %v128_v28  ;;  %v229_v28 = vsub.s32 5, %v696_v34 }
  0x2e   :  { %132 = vadd.xlane.f32.xlu0 %v131_v30  ;;  %135 = vadd.xlane.f32.xlu1 %v134_v31 }
  0xab   :  { %v115_v35 = vpop.xlane.xlu0 %114  ;;  %v121_v36 = vpop.xlane.xlu1 %120 }
  0xac   :  { %v137_v38 = vmul.f32 0.125, %v115_v35  ;;  %v139_v39 = vmul.f32 0.125, %v121_v36 }
  0xae   :  { %v158_v44 = vrot.slane %v137_v38, %v699_v37  ;;  %v166_v46 = vrot.slane %v139_v39, %v699_v37 }
  0xaf   :  { %v118_v40 = vpop.xlane.xlu0 %117  ;;  %v124_v42 = vpop.xlane.xlu1 %123 }
  0xb0   :  { %v138_v41 = vmul.f32 0.125, %v118_v40  ;;  %v140_v43 = vmul.f32 0.125, %v124_v42 }
  0xb2   :  { %v162_v45 = vrot.slane %v138_v41, %v699_v37  ;;  %v170_v47 = vrot.slane %v140_v43, %v699_v37 }
  0xb3   :  { %v127_v48 = vpop.xlane.xlu0 %126  ;;  %v130_v51 = vpop.xlane.xlu1 %129 }
  0xb4   :  { %v188_v49 = vsel %vm187_vm1, %v162_v45, %v158_v44  ;;  %v141_v50 = vmul.f32 0.125, %v127_v48  ;;  %v142_v53 = vmul.f32 0.125, %v130_v51 }
  0xb5   :  { %v190_v52 = vsel %vm189_vm2, %v166_v46, %v188_v49 }
  0xb6   :  { %v192_v54 = vsel %vm191_vm3, %v170_v47, %v190_v52  ;;  %v174_v55 = vrot.slane %v141_v50, %v699_v37  ;;  %v178_v56 = vrot.slane %v142_v53, %v699_v37 }
  0xb7   :  { %v133_v57 = vpop.xlane.xlu0 %132  ;;  %v136_v60 = vpop.xlane.xlu1 %135 }
  0xb8   :  { %v194_v58 = vsel %vm193_vm4, %v174_v55, %v192_v54  ;;  %v143_v59 = vmul.f32 0.125, %v133_v57  ;;  %v144_v61 = vmul.f32 0.125, %v136_v60 }
  0xb9   :  { %v196_v1 = vsel %vm195_vm5, %v178_v56, %v194_v58 }
  0xba   :  { %v182_v62 = vrot.slane %v143_v59, %v699_v37  ;;  %v186_v63 = vrot.slane %v144_v61, %v699_v37 }
  0xbc   :  { %v198_v3 = vsel %vm197_vm6, %v182_v62, %v196_v1 }
  0xbd   :  { %v200_v4 = vsel %vm199_vm7, %v186_v63, %v198_v3 }
  0xbe   :  { %v203_v6 = vsel %vm202_vm8, %v200_v4, -inf }
  0xbf   :  { %204 = vmax.xlane.f32.xlu0 %v203_v6 }
 0x148   :  { %v205_v14 = vpop.xlane.xlu0 %204 }
 0x149   :  { %v210_v16 = vrot.slane %v205_v14, %v209_v8  ;;  %v214_v17 = vrot.slane %v205_v14, %v213_v10  ;;  %v218_v18 = vrot.slane %v205_v14, %v217_v12  ;;  %v222_v20 = vrot.slane %v205_v14, %v221_v13 }
 0x14a   :  { %v226_v29 = vrot.slane %v205_v14, %v225_v19  ;;  %v230_v33 = vrot.slane %v205_v14, %v229_v28 }
 0x14b   :  { %v247_v21 = vsub.f32 %v137_v38, %v210_v16  ;;  %v248_v23 = vsub.f32 %v138_v41, %v214_v17  ;;  %v249_v25 = vsub.f32 %v139_v39, %v218_v18  ;;  %v250_v30 = vsub.f32 %v140_v43, %v222_v20 }
 0x14c   :  { %v251_v35 = vsub.f32 %v141_v50, %v226_v29  ;;  %v237_v38 = vsub.s32 7, %v696_v34  ;;  %v234_v39 = vrot.slane %v205_v14, %v233_v32  ;;  %v252_v40 = vsub.f32 %v142_v53, %v230_v33 }
 0x14d   :  { %v255_v26 = vmul.f32 1.442695, %v247_v21  ;;  %v257_v27 = vmul.f32 1.442695, %v248_v23  ;;  %v259_v31 = vmul.f32 1.442695, %v249_v25 }
 0x14e   :  { %v261_v36 = vmul.f32 1.442695, %v250_v30  ;;  %v263_v41 = vmul.f32 1.442695, %v251_v35  ;;  %v238_v42 = vrot.slane %v205_v14, %v237_v38  ;;  %v253_v43 = vsub.f32 %v143_v59, %v234_v39 }
 0x14f   :  { %551 = vpow2.f32 %v255_v26  ;;  %v265_v44 = vmul.f32 1.442695, %v252_v40 }
 0x150   :  { %553 = vpow2.f32 %v257_v27  ;;  %v254_v47 = vsub.f32 %v144_v61, %v238_v42  ;;  %v267_v48 = vmul.f32 1.442695, %v253_v43 }
 0x151   :  { %555 = vpow2.f32 %v259_v31 }
 0x152   :  { %557 = vpow2.f32 %v261_v36  ;;  %v269_v50 = vmul.f32 1.442695, %v254_v47 }
 0x153   :  { %559 = vpow2.f32 %v263_v41 }
 0x154   :  { %561 = vpow2.f32 %v265_v44 }
 0x155   :  { %563 = vpow2.f32 %v267_v48 }
 0x156   :  { %565 = vpow2.f32 %v269_v50 }
 0x15c   :  { %v552_v45 = vpop.eup %551 }
 0x15d   :  { %v554_v46 = vpop.eup %553  ;;  %280 = vperm.xlu1 %549, %v552_v45  }
 0x15e   :  { %283 = vperm.xlu0 %550, %v554_v46   ;;  %v556_v49 = vpop.eup %555 }
 0x15f   :  { %v558_v51 = vpop.eup %557 }
 0x160   :  { %v560_v52 = vpop.eup %559 }
 0x161   :  { %286 = vperm.xlu1 %549, %v556_v49   ;;  %v562_v53 = vpop.eup %561 }
 0x162   :  { %v564_v54 = vpop.eup %563 }
 0x163   :  { %v566_v55 = vpop.eup %565 }
 0x165   :  { %289 = vperm.xlu1 %549, %v558_v51  }
 0x169   :  { %292 = vperm.xlu1 %549, %v560_v52  }
 0x16d   :  { %295 = vperm.xlu1 %549, %v562_v53  }
 0x171   :  { %298 = vperm.xlu1 %549, %v564_v54  }
 0x175   :  { %301 = vperm.xlu1 %549, %v566_v55  }
 0x1d8   :  { %v281_v56 = vpop.permute.xlu1 %280 }
 0x1d9   :  { %v284_v60 = vpop.permute.xlu0 %283  ;;  %v306_v63 = vrot.slane %v281_v56, %v699_v37 }
 0x1da   :  { %v310_v62 = vrot.slane %v284_v60, %v699_v37 }
 0x1dc   :  { %v287_v57 = vpop.permute.xlu1 %286  ;;  %v335_v7 = vsel %vm187_vm1, %v310_v62, %v306_v63 }
 0x1dd   :  { %v314_v1 = vrot.slane %v287_v57, %v699_v37 }
 0x1df   :  { %v336_v16 = vsel %vm189_vm2, %v314_v1, %v335_v7 }
 0x1e0   :  { %v290_v58 = vpop.permute.xlu1 %289 }
 0x1e1   :  { %v318_v3 = vrot.slane %v290_v58, %v699_v37 }
 0x1e3   :  { %v337_v18 = vsel %vm191_vm3, %v318_v3, %v336_v16 }
 0x1e4   :  { %v293_v59 = vpop.permute.xlu1 %292 }
 0x1e5   :  { %v322_v4 = vrot.slane %v293_v59, %v699_v37 }
 0x1e7   :  { %v338_v20 = vsel %vm193_vm4, %v322_v4, %v337_v18 }
 0x1e8   :  { %v296_v61 = vpop.permute.xlu1 %295 }
 0x1e9   :  { %v326_v14 = vrot.slane %v296_v61, %v699_v37 }
 0x1eb   :  { %v339_v23 = vsel %vm195_vm5, %v326_v14, %v338_v20 }
 0x1ec   :  { %v299_v6 = vpop.permute.xlu1 %298 }
 0x1ed   :  { %v330_v17 = vrot.slane %v299_v6, %v699_v37 }
 0x1ef   :  { %v340_v26 = vsel %vm197_vm6, %v330_v17, %v339_v23 }
 0x1f0   :  { %v302_v21 = vpop.permute.xlu1 %301 }
 0x1f1   :  { %v334_v25 = vrot.slane %v302_v21, %v699_v37 }
 0x1f3   :  { %v341_v27 = vsel %vm199_vm7, %v334_v25, %v340_v26 }
 0x1f4   :  { %v343_v29 = vsel %vm202_vm8, %v341_v27, 0.0 }
 0x1f5   :  { %344 = vadd.xlane.f32.xlu1 %v343_v29 }
 0x27e   :  { %v345_v30 = vpop.xlane.xlu1 %344 }
 0x27f   :  { %567 = vrcp.f32 %v345_v30 }
 0x28c   :  { %v568_v31 = vpop.eup %567 }
 0x28d   :  { %v351_v33 = vrot.slane %v568_v31, %v209_v8  ;;  %v355_v36 = vrot.slane %v568_v31, %v213_v10  ;;  %v359_v37 = vrot.slane %v568_v31, %v217_v12  ;;  %v363_v41 = vrot.slane %v568_v31, %v221_v13 }
 0x28e   :  { %v367_v43 = vrot.slane %v568_v31, %v225_v19  ;;  %v371_v10 = vrot.slane %v568_v31, %v229_v28  ;;  %v375_v12 = vrot.slane %v568_v31, %v233_v32  ;;  %v379_v13 = vrot.slane %v568_v31, %v237_v38 }
 0x28f   :  { %v388_v35 = vmul.f32 %v552_v45, %v351_v33  ;;  %v389_v39 = vmul.f32 %v554_v46, %v355_v36  ;;  %v390_v40 = vmul.f32 %v556_v49, %v359_v37  ;;  %v391_v42 = vmul.f32 %v558_v51, %v363_v41 }
 0x290   :  { %v392_v8 = vmul.f32 %v560_v52, %v367_v43  ;;  %v393_v44 = vmul.f32 %v562_v53, %v371_v10  ;;  %v394_v45 = vmul.f32 %v564_v54, %v375_v12  ;;  %v395_v46 = vmul.f32 %v566_v55, %v379_v13 }
 0x291   :  { %398 = vperm.xlu0 %550, %v388_v35  }
 0x295   :  { %403 = vperm.xlu0 %550, %v389_v39  }
 0x299   :  { %408 = vperm.xlu0 %550, %v390_v40  }
 0x29d   :  { %413 = vperm.xlu0 %550, %v391_v42  }
 0x2a1   :  { %418 = vperm.xlu0 %550, %v392_v8  }
 0x2a5   :  { %423 = vperm.xlu0 %550, %v393_v44  }
 0x2a9   :  { %428 = vperm.xlu0 %550, %v394_v45  }
 0x2ad   :  { %433 = vperm.xlu0 %550, %v395_v46  }
 0x30c   :  { %v399_v47 = vpop.permute.xlu0 %398 }
 0x30d   :  { %v436_v28 = vmul.f32 %v399_v47, %v664_v0 }
 0x30f   :  { %v444_v34 = vsel %vm112_vm0, %v436_v28, 0.0 }
 0x310   :  { %v404_v19 = vpop.permute.xlu0 %403  ;;  %v445_v56 = vrot.slane %v444_v34, 4 }
 0x311   :  { %v437_v48 = vmul.f32 %v404_v19, %v669_v5 }
 0x312   :  { %v446_v60 = vadd.f32 %v445_v56, %v444_v34 }
 0x313   :  { %v451_v51 = vsel %vm112_vm0, %v437_v48, 0.0 }
 0x314   :  { %v409_v49 = vpop.permute.xlu0 %408  ;;  %v452_v53 = vrot.slane %v451_v51, 4  ;;  %v447_v7 = vrot.slane %v446_v60, 2 }
 0x315   :  { %v438_v50 = vmul.f32 %v409_v49, %v666_v2 }
 0x316   :  { %v453_v58 = vadd.f32 %v452_v53, %v451_v51  ;;  %v448_v26 = vadd.f32 %v447_v7, %v446_v60 }
 0x317   :  { %v458_v32 = vsel %vm112_vm0, %v438_v50, 0.0 }
 0x318   :  { %v414_v52 = vpop.permute.xlu0 %413  ;;  %v459_v54 = vrot.slane %v458_v32, 4 }
 0x319   :  { %v439_v38 = vmul.f32 %v414_v52, %v673_v9  ;;  %v454_v9 = vrot.slane %v453_v58, 2 }
 0x31a   :  { %v460_v2 = vadd.f32 %v459_v54, %v458_v32 }
 0x31b   :  { %v465_v55 = vsel %vm112_vm0, %v439_v38, 0.0  ;;  %v455_v20 = vadd.f32 %v454_v9, %v453_v58 }
 0x31c   :  { %v466_v5 = vrot.slane %v465_v55, 4  ;;  %v419_v57 = vpop.permute.xlu0 %418  ;;  %v461_v4 = vrot.slane %v460_v2, 2 }
 0x31d   :  { %v440_v0 = vmul.f32 %v419_v57, %v675_v11  ;;  %v456_v35 = vrot.slane %v455_v20, 1 }
 0x31e   :  { %v467_v61 = vadd.f32 %v466_v5, %v465_v55  ;;  %v462_v23 = vadd.f32 %v461_v4, %v460_v2 }
 0x31f   :  { %v472_v59 = vsel %vm112_vm0, %v440_v0, 0.0  ;;  %v457_v10 = vadd.f32 %v456_v35, %v455_v20 }
 0x320   :  { %v473_v62 = vrot.slane %v472_v59, 4  ;;  %v424_v63 = vpop.permute.xlu0 %423  ;;  %v468_v14 = vrot.slane %v467_v61, 2  ;;  %v463_v37 = vrot.slane %v462_v23, 1 }
 0x321   :  { %v441_v1 = vmul.f32 %v424_v63, %v679_v15 }
 0x322   :  { %v474_v3 = vadd.f32 %v473_v62, %v472_v59  ;;  %v469_v27 = vadd.f32 %v468_v14, %v467_v61  ;;  %v464_v13 = vadd.f32 %v463_v37, %v462_v23 }
 0x323   :  { %v479_v6 = vsel %vm112_vm0, %v441_v1, 0.0 }
 0x324   :  { %v480_v16 = vrot.slane %v479_v6, 4  ;;  %v429_v17 = vpop.permute.xlu0 %428  ;;  %v475_v11 = vrot.slane %v474_v3, 2  ;;  %v470_v41 = vrot.slane %v469_v27, 1 }
 0x325   :  { %v442_v18 = vmul.f32 %v429_v17, %v686_v22  ;;  %v449_v22 = vrot.slane %v448_v26, 1 }
 0x326   :  { %v481_v21 = vadd.f32 %v480_v16, %v479_v6  ;;  %v476_v31 = vadd.f32 %v475_v11, %v474_v3  ;;  %v471_v47 = vadd.f32 %v470_v41, %v469_v27 }
 0x327   :  { %v486_v25 = vsel %vm112_vm0, %v442_v18, 0.0  ;;  %v450_v46 = vadd.f32 %v449_v22, %v448_v26 }
 0x328   :  { %v482_v15 = vrot.slane %v481_v21, 2  ;;  %v487_v29 = vrot.slane %v486_v25, 4  ;;  %v434_v30 = vpop.permute.xlu0 %433  ;;  %v477_v8 = vrot.slane %v476_v31, 1 }
 0x329   :  { %v443_v33 = vmul.f32 %v434_v30, %v688_v24  ;;  %v508_v49 = vsel %vm187_vm1, %v457_v10, %v450_v46 }
 0x32a   :  { %v483_v36 = vadd.f32 %v482_v15, %v481_v21  ;;  %v488_v39 = vadd.f32 %v487_v29, %v486_v25  ;;  %v478_v48 = vadd.f32 %v477_v8, %v476_v31  ;;  %v509_v51 = vsel %vm189_vm2, %v464_v13, %v508_v49 }
 0x32b   :  { %v493_v40 = vsel %vm112_vm0, %v443_v33, 0.0  ;;  %v510_v52 = vsel %vm191_vm3, %v471_v47, %v509_v51 }
 0x32c   :  { %v489_v42 = vrot.slane %v488_v39, 2  ;;  %v494_v43 = vrot.slane %v493_v40, 4  ;;  %v484_v44 = vrot.slane %v483_v36, 1  ;;  %v511_v38 = vsel %vm193_vm4, %v478_v48, %v510_v52 }
 0x32e   :  { %v490_v12 = vadd.f32 %v489_v42, %v488_v39  ;;  %v495_v45 = vadd.f32 %v494_v43, %v493_v40  ;;  %v485_v28 = vadd.f32 %v484_v44, %v483_v36 }
 0x330   :  { %v491_v19 = vrot.slane %v490_v12, 1  ;;  %v496_v24 = vrot.slane %v495_v45, 2  ;;  %v512_v54 = vsel %vm195_vm5, %v485_v28, %v511_v38 }
 0x332   :  { %v497_v50 = vadd.f32 %v496_v24, %v495_v45  ;;  %v492_v32 = vadd.f32 %v491_v19, %v490_v12 }
 0x334   :  { %v498_v34 = vrot.slane %v497_v50, 1  ;;  %v513_v55 = vsel %vm197_vm6, %v492_v32, %v512_v54 }
 0x336   :  { %v499_v53 = vadd.f32 %v498_v34, %v497_v50 }
 0x338   :  { %v514_v56 = vsel %vm199_vm7, %v499_v53, %v513_v55 }
 0x339   :  { %516 = vst.msk [vmem:[#allocation7] sm:$0xff] %vm112_vm0, %v514_v56 }
 0x33a   :  { %620 = shalt.err (!%p617_p0)
}
 0x33b   :  { %526 = dma.vmem_to_hbm [thread:$0]  %s524_s1, 128, %s802_s2, [#allocation4]  }
 0x33c   :  { %633 = dma.done.wait [#allocation4], 128  }
 0x33d   :  { %634 = vsyncadd [#allocation4], 4294967168 }
 0x33e   :  { %530 = vsyncpa [#allocation3], 1 }
 0x33f   :  { %531 = vsyncpa [#allocation6], 1 }
 0x340   :  { %532 = vsyncpa [#allocation4], 1 }

</bundles_post_ra>
